<compile_context>
chip_gen: v6e
topology: v6e:2x2x1
jax: 0.10.0
libtpu: 0.0.40
codegen_flags: <defaults>
</compile_context>

<pallas_src>
import functools

import jax
import jax.numpy as jnp
from jax.experimental import pallas as pl
from jax.experimental.pallas import tpu as pltpu


def _mlp_kernel(x_ref, w1_ref, b1_ref, w2_ref, b2_ref, o_ref):
    # Single bias broadcast per kernel body (no inner loops -> no replication).
    b1 = b1_ref[...]                      # [1, d1]
    b2 = b2_ref[...]                      # [1, d2]

    # Layer 1: Linear + ReLU (+ Dropout as identity in eval mode)
    h = jnp.dot(x_ref[...], w1_ref[...], preferred_element_type=jnp.float32)
    h = jnp.maximum(h + b1, 0.0)

    # Layer 2: Linear + ReLU (+ Dropout as identity in eval mode)
    y = jnp.dot(h, w2_ref[...], preferred_element_type=jnp.float32)
    o_ref[...] = jnp.maximum(y + b2, 0.0).astype(o_ref.dtype)


def pack_params(w1, b1, w2, b2):
    """Pre-pack PyTorch-layout params (weight [out, in], bias [out]) into
    kernel layout: weights [in, out], biases [1, out]. Call ONCE at load time."""
    w1_t = jnp.asarray(w1, jnp.float32).T                       # [d0, d1]
    w2_t = jnp.asarray(w2, jnp.float32).T                       # [d1, d2]
    b1_r = jnp.asarray(b1, jnp.float32).reshape(1, -1)          # [1, d1]
    b2_r = jnp.asarray(b2, jnp.float32).reshape(1, -1)          # [1, d2]
    return w1_t, b1_r, w2_t, b2_r


@functools.partial(jax.jit, static_argnames=("block_batch",))
def stroke_dnn_forward(x, w1_t, b1_r, w2_t, b2_r, *, block_batch=512):
    """x: [B, d0] float32; params already packed via pack_params()."""
    x = jnp.asarray(x, jnp.float32)
    B, d0 = x.shape
    d1 = w1_t.shape[1]
    d2 = w2_t.shape[1]

    # Batch tile: multiple of 8 (f32 sublane) when tiling, else a single block
    # equal to the full batch (satisfies the (8,128) block-shape rule either way).
    if B >= block_batch:
        tb = block_batch
    else:
        tb = B
    grid = (pl.cdiv(B, tb),)

    flops = 2 * B * (d0 * d1 + d1 * d2)
    bytes_accessed = 4 * (B * d0 + d0 * d1 + d1 + d1 * d2 + d2 + B * d2)

    return pl.pallas_call(
        _mlp_kernel,
        out_shape=jax.ShapeDtypeStruct((B, d2), jnp.float32),
        grid=grid,
        in_specs=[
            pl.BlockSpec((tb, d0), lambda i: (i, 0)),   # x tile (pipelined)
            pl.BlockSpec((d0, d1), lambda i: (0, 0)),   # w1^T (resident)
            pl.BlockSpec((1, d1), lambda i: (0, 0)),    # b1   (resident)
            pl.BlockSpec((d1, d2), lambda i: (0, 0)),   # w2^T (resident)
            pl.BlockSpec((1, d2), lambda i: (0, 0)),    # b2   (resident)
        ],
        out_specs=pl.BlockSpec((tb, d2), lambda i: (i, 0)),
        compiler_params=pltpu.CompilerParams(
            dimension_semantics=("parallel",),
        ),
        cost_estimate=pl.CostEstimate(
            flops=flops, bytes_accessed=bytes_accessed, transcendentals=0
        ),
    )(x, w1_t, b1_r, w2_t, b2_r)


def _reference(x, w1, b1, w2, b2):
    h = jnp.maximum(x @ w1.T + b1, 0.0)
    return jnp.maximum(h @ w2.T + b2, 0.0)


if __name__ == "__main__":
    # num_dims = [d0, d1, d2] as in Stroke_DNN_Model(num_dims)
    num_dims = [32, 64, 16]
    batch = 8

    key = jax.random.PRNGKey(0)
    kx, kw1, kb1, kw2, kb2 = jax.random.split(key, 5)

    x = jax.random.normal(kx, (batch, num_dims[0]), dtype=jnp.float32)
    # Shapes match nn.Linear: weight [out, in], bias [out].
    w1 = jax.random.normal(kw1, (num_dims[1], num_dims[0]), dtype=jnp.float32) * 0.1
    b1 = jax.random.normal(kb1, (num_dims[1],), dtype=jnp.float32) * 0.1
    w2 = jax.random.normal(kw2, (num_dims[2], num_dims[1]), dtype=jnp.float32) * 0.1
    b2 = jax.random.normal(kb2, (num_dims[2],), dtype=jnp.float32) * 0.1

    # Pre-pack once (model-load time), reuse across calls.
    w1_t, b1_r, w2_t, b2_r = pack_params(w1, b1, w2, b2)

    out = stroke_dnn_forward(x, w1_t, b1_r, w2_t, b2_r)
    out = jax.block_until_ready(out)

    ref = _reference(x, w1, b1, w2, b2)
    assert out.shape == (batch, num_dims[2])
    assert jnp.allclose(out, ref, atol=1e-5, rtol=1e-5)
    print("KERNEL_OK")
</pallas_src>

<mosaic_0001>
module attributes {stable_mosaic.version = 11 : i64} {
  func.func @_mlp_kernel(%arg0: i32, %arg1: memref<8x32xf32, #tpu.memory_space<vmem>>, %arg2: memref<32x64xf32, #tpu.memory_space<vmem>>, %arg3: memref<1x64xf32, #tpu.memory_space<vmem>>, %arg4: memref<64x16xf32, #tpu.memory_space<vmem>>, %arg5: memref<1x16xf32, #tpu.memory_space<vmem>>, %arg6: memref<8x16xf32, #tpu.memory_space<vmem>>) attributes {dimension_semantics = [#tpu.dimension_semantics<parallel>], iteration_bounds = array<i64: 1>, scalar_prefetch = 0 : i64, scratch_operands = 0 : i64, tpu.core_type = #tpu.core_type<tc>, window_params = [{transform_indices = @transform_0, window_bounds = array<i64: 8, 32>}, {pipeline_mode = #tpu.pipeline_mode<synchronous>, transform_indices = @transform_1, window_bounds = array<i64: 32, 64>}, {pipeline_mode = #tpu.pipeline_mode<synchronous>, transform_indices = @transform_2, window_bounds = array<i64: 1, 64>}, {pipeline_mode = #tpu.pipeline_mode<synchronous>, transform_indices = @transform_3, window_bounds = array<i64: 64, 16>}, {pipeline_mode = #tpu.pipeline_mode<synchronous>, transform_indices = @transform_4, window_bounds = array<i64: 1, 16>}, {transform_indices = @transform_5, window_bounds = array<i64: 8, 16>}]} {
    %c0 = arith.constant 0 : index
    %c0_0 = arith.constant 0 : index
    %0 = vector.load %arg3[%c0, %c0_0] : memref<1x64xf32, #tpu.memory_space<vmem>>, vector<1x64xf32>
    %c0_1 = arith.constant 0 : index
    %c0_2 = arith.constant 0 : index
    %1 = vector.load %arg5[%c0_1, %c0_2] : memref<1x16xf32, #tpu.memory_space<vmem>>, vector<1x16xf32>
    %c0_3 = arith.constant 0 : index
    %c0_4 = arith.constant 0 : index
    %2 = vector.load %arg1[%c0_3, %c0_4] : memref<8x32xf32, #tpu.memory_space<vmem>>, vector<8x32xf32>
    %c0_5 = arith.constant 0 : index
    %c0_6 = arith.constant 0 : index
    %3 = vector.load %arg2[%c0_5, %c0_6] : memref<32x64xf32, #tpu.memory_space<vmem>>, vector<32x64xf32>
    %cst = arith.constant dense<0.000000e+00> : vector<8x64xf32>
    %4 = tpu.matmul %2, %3, %cst {dimension_numbers = #tpu.dot_dimension_numbers<[1], [0], [0], [1], [0, 0, 1, 1], [], []>} : vector<8x32xf32>, vector<32x64xf32>, vector<8x64xf32> -> vector<8x64xf32>
    %5 = vector.broadcast %0 : vector<1x64xf32> to vector<8x64xf32>
    %6 = arith.addf %4, %5 : vector<8x64xf32>
    %cst_7 = arith.constant 0.000000e+00 : f32
    %7 = vector.broadcast %cst_7 : f32 to vector<8x64xf32>
    %8 = arith.maximumf %6, %7 : vector<8x64xf32>
    %c0_8 = arith.constant 0 : index
    %c0_9 = arith.constant 0 : index
    %9 = vector.load %arg4[%c0_8, %c0_9] : memref<64x16xf32, #tpu.memory_space<vmem>>, vector<64x16xf32>
    %cst_10 = arith.constant dense<0.000000e+00> : vector<8x16xf32>
    %10 = tpu.matmul %8, %9, %cst_10 {dimension_numbers = #tpu.dot_dimension_numbers<[1], [0], [0], [1], [0, 0, 1, 1], [], []>} : vector<8x64xf32>, vector<64x16xf32>, vector<8x16xf32> -> vector<8x16xf32>
    %11 = vector.broadcast %1 : vector<1x16xf32> to vector<8x16xf32>
    %12 = arith.addf %10, %11 : vector<8x16xf32>
    %cst_11 = arith.constant 0.000000e+00 : f32
    %13 = vector.broadcast %cst_11 : f32 to vector<8x16xf32>
    %14 = arith.maximumf %12, %13 : vector<8x16xf32>
    %c0_12 = arith.constant 0 : index
    %c0_13 = arith.constant 0 : index
    %15 = vector.load %arg6[%c0_12, %c0_13] : memref<8x16xf32, #tpu.memory_space<vmem>>, vector<8x16xf32>
    tpu.vector_store %arg6[%c0_12, %c0_13], %14 {strides = array<i32>} : memref<8x16xf32, #tpu.memory_space<vmem>>, vector<8x16xf32>,
    return
  }
  func.func @transform_0(%arg0: i32) -> (i32, i32) {
    %c0_i32 = arith.constant 0 : i32
    %c0_i32_0 = arith.constant 0 : i32
    return %arg0, %c0_i32 : i32, i32
  }
  func.func @transform_1(%arg0: i32) -> (i32, i32) {
    %c0_i32 = arith.constant 0 : i32
    %c0_i32_0 = arith.constant 0 : i32
    %c0_i32_1 = arith.constant 0 : i32
    return %c0_i32, %c0_i32_0 : i32, i32
  }
  func.func @transform_2(%arg0: i32) -> (i32, i32) {
    %c0_i32 = arith.constant 0 : i32
    %c0_i32_0 = arith.constant 0 : i32
    %c0_i32_1 = arith.constant 0 : i32
    return %c0_i32, %c0_i32_0 : i32, i32
  }
  func.func @transform_3(%arg0: i32) -> (i32, i32) {
    %c0_i32 = arith.constant 0 : i32
    %c0_i32_0 = arith.constant 0 : i32
    %c0_i32_1 = arith.constant 0 : i32
    return %c0_i32, %c0_i32_0 : i32, i32
  }
  func.func @transform_4(%arg0: i32) -> (i32, i32) {
    %c0_i32 = arith.constant 0 : i32
    %c0_i32_0 = arith.constant 0 : i32
    %c0_i32_1 = arith.constant 0 : i32
    return %c0_i32, %c0_i32_0 : i32, i32
  }
  func.func @transform_5(%arg0: i32) -> (i32, i32) {
    %c0_i32 = arith.constant 0 : i32
    %c0_i32_0 = arith.constant 0 : i32
    return %arg0, %c0_i32 : i32, i32
  }
}

</mosaic_0001>

<bundles_post_ra>
// kernel: stroke_dnn_forward.1
= control target key start
LH: loop header
LB: loop body
LE: loop exit
PB: predicated region body
PF: predicated region fallthrough
CT: control target
= control target key end

     0   :  { %v287_v1 = vmov 0.0   ;;  %vm288_vm0 = vmmov 0   ;;  %s370_s0 = inlined_call_operand.vmem [shape: f32[8,32], index: 0, kind: input, shape index: {}]   ;;  %s371_s1 = inlined_call_operand.vmem [shape: f32[32,64], index: 1, kind: input, shape index: {}]   ;;  %s372_s2 = inlined_call_operand.vmem [shape: f32[1,64], index: 2, kind: input, shape index: {}]   ;;  %s373_s3 = inlined_call_operand.vmem [shape: f32[64,16], index: 3, kind: input, shape index: {}]   ;;  %s374_s4 = inlined_call_operand.vmem [shape: f32[1,16], index: 4, kind: input, shape index: {}]   ;;  %s375_s5 = inlined_call_operand.hbm [shape: f32[8,16], index: 5, kind: output, shape index: {}]  }
   0x1   :  { %v27_v0 = vld [vmem:[%s371_s1 + $0x18] sm:$0xff]  ;;  %232 = vmatprep.subr.mxu0 %v287_v1  ;;  %v26_v2 = vld [vmem:[%s371_s1 + $0x10] sm:$0xff]  ;;  %240 = vmatprep.mubr.msk.f32.mxu0 %vm288_vm0, %v287_v1  ;;  %v25_v5 = vld [vmem:[%s371_s1 + $0x8] sm:$0xff] }
   0x2   :  { %v116_v3 = vld [vmem:[%s373_s3 + $0x38] sm:$0xff]  ;;  %233 = vmatpush3.msra.mxu0 %v27_v0  ;;  %243 = vmatprep.subr.mxu1 %v287_v1  ;;  %v115_v4 = vld [vmem:[%s373_s3 + $0x30] sm:$0xff] }
   0x3   :  { %234 = vmatprep.subr.mxu0 %v287_v1  ;;  %244 = vmatpush3.msra.mxu1 %v116_v3 }
   0x4   :  { %10 = vsyncpa [#allocation3], 0  ;;  %235 = vmatpush3.msra.mxu0 %v26_v2  ;;  %245 = vmatprep.subr.mxu1 %v287_v1  ;;  %v114_v6 = vld [vmem:[%s373_s3 + $0x28] sm:$0xff]  ;;  %v24_v7 = vld [vmem:[%s371_s1] sm:$0xff]  ;;  %vm34_vm1 = vcmask 261120   ;;  %vm123_vm2 = vcmask 523264  }
   0x5   :  { %236 = vmatprep.subr.mxu0 %v287_v1  ;;  %246 = vmatpush3.msra.mxu1 %v115_v4  ;;  %v23_v8 = vld [vmem:[%s370_s0] sm:$0xff]  ;;  %v112_v10 = vld [vmem:[%s373_s3 + $0x18] sm:$0xff]  ;;  %v111_v11 = vld [vmem:[%s373_s3 + $0x10] sm:$0xff]  ;;  %s289_s21 = smov [#allocation2]   ;;  %vm198_vm3 = vcmask 130048  }
   0x6   :  { %237 = vmatpush3.msra.mxu0 %v25_v5  ;;  %247 = vmatprep.subr.mxu1 %v287_v1  ;;  %v113_v9 = vld [vmem:[%s373_s3 + $0x20] sm:$0xff]  ;;  %v110_v12 = vld [vmem:[%s373_s3 + $0x8] sm:$0xff]  ;;  %s206_s22 = sshll.u32 %s289_s21, 4  ;;  %s207_s22 = int_to_ptr.vmem [resolvable:$true] %s206_s22 }
   0x7   :  { %238 = vmatprep.subr.mxu0 %v287_v1  ;;  %248 = vmatpush3.msra.mxu1 %v114_v6  ;;  %v109_v13 = vld [vmem:[%s373_s3] sm:$0xff]  ;;  %p270_p1 = scmp.lt.s32.totalorder %s207_s22, %s207_s22 }
   0x8   :  { %239 = vmatpush3.msra.mxu0 %v24_v7  ;;  %249 = vmatprep.subr.mxu1 %v287_v1  ;;  %v214_v14 = vld [vmem:[%s372_s2] ss:$0 sm:$0xff]  ;;  %s265_s2 = scalar_lea.vmem %s207_s22, 128 }
   0x9   :  { %241 = vmatmul.mubr.msk.f32.vlgmr.msra.gmra.mxu0 %vm34_vm1, %v23_v8  ;;  %250 = vmatpush3.msra.mxu1 %v113_v9  ;;  %v216_v19 = vld [vmem:[%s374_s4] ss:$0 sm:$0xff]  ;;  %p266_p0 = scmp.ne.s32.totalorder %s207_s22, %s265_s2  ;;  %p271_p2 = scmp.lt.s32.totalorder %s265_s2, %s265_s2 }
   0xa   :  { %251 = vmatprep.subr.mxu1 %v287_v1  ;;  %259 = vmatprep.mubr.msk.f32.mxu1 %vm288_vm0, %v287_v1 }
   0xb   :  { %252 = vmatpush3.msra.mxu1 %v112_v10  ;;  %p272_p3 = por %p271_p2, %p270_p1 }
   0xc   :  { %253 = vmatprep.subr.mxu1 %v287_v1 }
   0xd   :  { %254 = vmatpush3.msra.mxu1 %v111_v11  ;;  %p273_p4 = pnand %p272_p3, %p266_p0 }
   0xe   :  { %255 = vmatprep.subr.mxu1 %v287_v1 }
   0xf   :  { %256 = vmatpush3.msra.mxu1 %v110_v12 }
  0x10   :  { %257 = vmatprep.subr.mxu1 %v287_v1 }
  0x11   :  { %258 = vmatpush3.msra.mxu1 %v109_v13 }
  0xc9   :  { %v104_v15 = vpop.f32.mrf.mxu0 }
  0xca   :  { %v105_v16 = vadd.f32 %v214_v14, %v104_v15 }
  0xcb   :  { %v242_v17 = vpop.f32.mrf.mxu0 }
  0xcc   :  { %v108_v18 = vmax.f32 %v105_v16, 0.0 }
  0xce   :  { %260 = vmatmul.mubr.msk.f32.vlgmr.msra.gmra.mxu1 %vm123_vm2, %v108_v18 }
 0x18e   :  { %v193_v20 = vpop.f32.mrf.mxu1 }
 0x18f   :  { %v194_v21 = vadd.f32 %v216_v19, %v193_v20 }
 0x190   :  { %v261_v22 = vpop.f32.mrf.mxu1 }
 0x191   :  { %v197_v23 = vmax.f32 %v194_v21, 0.0 }
 0x193   :  { %199 = vst.msk [vmem:[#allocation2] sm:$0xff] %vm198_vm3, %v197_v23 }
 0x194   :  { %276 = shalt.err (!%p273_p4)
}
 0x195   :  { %209 = dma.vmem_to_hbm [thread:$0]  %s207_s22, 128, %s375_s5, [#allocation3]  }
 0x196   :  { %285 = dma.done.wait [#allocation3], 128  }
 0x197   :  { %286 = vsyncadd [#allocation3], 4294967168 }
 0x198   :  { %213 = vsyncpa [#allocation3], 1 }

</bundles_post_ra>
